<compile_context>
chip_gen: v5e
topology: v5e:2x2
jax: 0.10.0
libtpu: 0.0.40
codegen_flags: <defaults>
</compile_context>

<pallas_src>
import functools

import jax
import jax.numpy as jnp
from jax.experimental import pallas as pl
from jax.experimental.pallas import tpu as pltpu


# ----------------------------- Pallas kernels ------------------------------

def _apply_act(acc, act):
    if act == "relu":
        return jnp.maximum(acc, 0.0)
    if act == "sigmoid":
        # exp on the EUP; approx reciprocal also rides the EUP slot.
        return pl.reciprocal(1.0 + jnp.exp(-acc), approx=True)
    return acc


def _conv_mm_kernel(w_ref, c_ref, b_ref, o_ref, *, act):
    # w: (Cout, K) bf16, c: (K, TM) bf16, b: (Cout, 1) f32, o: (Cout, TM) f32
    acc = jnp.dot(w_ref[...], c_ref[...], preferred_element_type=jnp.float32)
    acc = acc + b_ref[...]                 # broadcast over the lane (pixel) axis
    o_ref[...] = _apply_act(acc, act)


def conv_matmul(wmat, cols, bias, act):
    """Lane-dense conv matmul: (Cout,K)@(K,M) + bias, fused activation."""
    Cout, K = wmat.shape
    K2, M = cols.shape
    assert K == K2
    # TODO(synk): at production sizes parameterize the M-tile by generation
    # (larger on 128 MiB VMEM v5e/v6e, smaller on 64 MiB v7x).
    TM = 256 if (M > 256 and M % 256 == 0) else M
    grid = (M // TM,)
    return pl.pallas_call(
        functools.partial(_conv_mm_kernel, act=act),
        out_shape=jax.ShapeDtypeStruct((Cout, M), jnp.float32),
        grid=grid,
        in_specs=[
            pl.BlockSpec((Cout, K), lambda i: (0, 0)),
            pl.BlockSpec((K, TM), lambda i: (0, i)),
            pl.BlockSpec((Cout, 1), lambda i: (0, 0)),
        ],
        out_specs=pl.BlockSpec((Cout, TM), lambda i: (0, i)),
        compiler_params=pltpu.CompilerParams(
            dimension_semantics=("parallel",)),
    )(wmat.astype(jnp.bfloat16), cols.astype(jnp.bfloat16),
      bias.reshape(Cout, 1).astype(jnp.float32))


def _latent_fused_kernel(flat_ref, wenc_ref, benc_ref, emb_ref,
                         wdec_ref, bdec_ref, o_ref):
    # fc_enc -> + bias + class embedding -> fc_dec -> ReLU, all in VMEM.
    z = jnp.dot(flat_ref[...], wenc_ref[...], preferred_element_type=jnp.float32)
    z = z + benc_ref[...] + emb_ref[...]
    h = jnp.dot(z.astype(jnp.bfloat16), wdec_ref[...],
                preferred_element_type=jnp.float32)
    o_ref[...] = jnp.maximum(h + bdec_ref[...], 0.0)


def latent_fused(flat, wenc, benc, emb_y, wdec, bdec):
    B, Fin = flat.shape
    L = wenc.shape[1]
    Fout = wdec.shape[1]
    return pl.pallas_call(
        _latent_fused_kernel,
        out_shape=jax.ShapeDtypeStruct((B, Fout), jnp.float32),
        grid=(1,),
        in_specs=[
            pl.BlockSpec((B, Fin), lambda i: (0, 0)),
            pl.BlockSpec((Fin, L), lambda i: (0, 0)),
            pl.BlockSpec((1, L), lambda i: (0, 0)),
            pl.BlockSpec((B, L), lambda i: (0, 0)),
            pl.BlockSpec((L, Fout), lambda i: (0, 0)),
            pl.BlockSpec((1, Fout), lambda i: (0, 0)),
        ],
        out_specs=pl.BlockSpec((B, Fout), lambda i: (0, 0)),
    )(flat.astype(jnp.bfloat16), wenc.astype(jnp.bfloat16),
      benc.reshape(1, L).astype(jnp.float32), emb_y.astype(jnp.float32),
      wdec.astype(jnp.bfloat16), bdec.reshape(1, Fout).astype(jnp.float32))


def _deconv_phase_kernel(w_ref, c_ref, b_ref, o_ref, *, act):
    # w: (4, Cout, K) bf16, c: (4, K, M) bf16, b: (Cout, 1) f32, o: (4, Cout, M)
    for p in range(w_ref.shape[0]):
        acc = jnp.dot(w_ref[p], c_ref[p], preferred_element_type=jnp.float32)
        acc = acc + b_ref[...]
        o_ref[p] = _apply_act(acc, act)


def deconv_phase_matmul(wph, cph, bias, act):
    P, Cout, K = wph.shape
    _, K2, M = cph.shape
    assert K == K2
    return pl.pallas_call(
        functools.partial(_deconv_phase_kernel, act=act),
        out_shape=jax.ShapeDtypeStruct((P, Cout, M), jnp.float32),
        grid=(1,),
        in_specs=[
            pl.BlockSpec((P, Cout, K), lambda i: (0, 0, 0)),
            pl.BlockSpec((P, K, M), lambda i: (0, 0, 0)),
            pl.BlockSpec((Cout, 1), lambda i: (0, 0)),
        ],
        out_specs=pl.BlockSpec((P, Cout, M), lambda i: (0, 0, 0)),
    )(wph.astype(jnp.bfloat16), cph.astype(jnp.bfloat16),
      bias.reshape(Cout, 1).astype(jnp.float32))


# ------------------------------ conv lowering -------------------------------
# Activations are kept in channel-major "CBHW" layout (C, B, H, W) between
# stages; the matmul contraction axis (c, kh, kw) matches PyTorch's
# w.reshape(Cout, Cin*k*k) ordering.

def im2col_T(x_cbhw, k, stride, pad):
    """(C,B,H,W) -> (C*k*k, B*Ho*Wo) with row order (c, kh, kw)."""
    C, B, H, W = x_cbhw.shape
    Ho = (H + 2 * pad - k) // stride + 1
    Wo = (W + 2 * pad - k) // stride + 1
    xp = jnp.pad(x_cbhw, ((0, 0), (0, 0), (pad, pad), (pad, pad)))
    taps = []
    for kh in range(k):
        for kw in range(k):
            taps.append(xp[:, :, kh:kh + stride * Ho:stride,
                           kw:kw + stride * Wo:stride])
    cols = jnp.stack(taps, axis=1)                      # (C, k*k, B, Ho, Wo)
    return cols.reshape(C * k * k, B * Ho * Wo), Ho, Wo


def conv2d_cbhw(x_cbhw, w, b, stride, pad, act):
    """PyTorch Conv2d semantics; x in CBHW, w (Cout, Cin, k, k) -> CBHW out."""
    Cout, Cin, k, _ = w.shape
    _, B, H, W = x_cbhw.shape
    cols, Ho, Wo = im2col_T(x_cbhw, k, stride, pad)
    wmat = w.reshape(Cout, Cin * k * k)
    out = conv_matmul(wmat, cols, b, act)               # (Cout, B*Ho*Wo)
    return out.reshape(Cout, B, Ho, Wo)


# Sub-pixel decomposition of ConvTranspose2d(k=4, stride=2, pad=1):
# output phase po (row parity) uses kernel rows {1,3}/{0,2} with input-row
# offsets dh; same for columns.  Each phase is a stride-1 2x2-tap conv.
_TAPS = {0: ((1, 0), (3, -1)), 1: ((0, 1), (2, 0))}     # (k_index, input_offset)


def _deconv_phase_weights(w):
    """(Cin, Cout, 4, 4) -> (4, Cout, Cin*4); phase = 2*po + qo."""
    Cin, Cout = w.shape[0], w.shape[1]
    ws = []
    for po in (0, 1):
        for qo in (0, 1):
            sel = [w[:, :, kh, kw]
                   for (kh, _) in _TAPS[po] for (kw, _) in _TAPS[qo]]
            wp = jnp.stack(sel, axis=1).reshape(Cin * 4, Cout).T
            ws.append(wp)
    return jnp.stack(ws, axis=0)


def _deconv_phase_cols(x_cbhw):
    """(Cin, B, H, W) -> (4, Cin*4, B*H*W); same (ci, tap) row ordering."""
    Cin, B, H, W = x_cbhw.shape
    xp = jnp.pad(x_cbhw, ((0, 0), (0, 0), (1, 1), (1, 1)))
    cs = []
    for po in (0, 1):
        for qo in (0, 1):
            taps = [xp[:, :, 1 + dh:1 + dh + H, 1 + dw:1 + dw + W]
                    for (_, dh) in _TAPS[po] for (_, dw) in _TAPS[qo]]
            cols = jnp.stack(taps, axis=1).reshape(Cin * 4, B * H * W)
            cs.append(cols)
    return jnp.stack(cs, axis=0)


def conv_transpose2d_cbhw(x_cbhw, w, b, act):
    """PyTorch ConvTranspose2d(k=4, s=2, p=1); x CBHW, w (Cin, Cout, 4, 4)."""
    Cin, B, H, W = x_cbhw.shape
    Cout = w.shape[1]
    wph = _deconv_phase_weights(w)                      # (4, Cout, Cin*4)
    cph = _deconv_phase_cols(x_cbhw)                    # (4, Cin*4, B*H*W)
    out = deconv_phase_matmul(wph, cph, b, act)         # (4, Cout, B*H*W)
    out = out.reshape(2, 2, Cout, B, H, W)              # (po, qo, co, b, i, j)
    out = out.transpose(2, 3, 4, 0, 5, 1)               # (co, b, i, po, j, qo)
    return out.reshape(Cout, B, 2 * H, 2 * W)


# -------------------------------- EAE forward -------------------------------

def eae_forward(x, y, p, *, image_size, std_channel):
    B = x.shape[0]
    x_cbhw = jnp.transpose(x, (1, 0, 2, 3))                               # CBHW
    h1 = conv2d_cbhw(x_cbhw, p["conv1_w"], p["conv1_b"], 2, 1, "relu")
    h2 = conv2d_cbhw(h1, p["conv2_w"], p["conv2_b"], 2, 1, "relu")
    # NCHW-order flatten (c outer) to match PyTorch's .view(B, -1).
    flat = jnp.transpose(h2, (1, 0, 2, 3)).reshape(B, -1)
    emb_y = p["emb"][y]                                                   # (B, latent)
    h = latent_fused(flat, p["fc_enc_w"], p["fc_enc_b"], emb_y,
                     p["fc_dec_w"], p["fc_dec_b"])                        # (B, flat)
    s4 = image_size // 4
    d_in = h.reshape(B, 2 * std_channel, s4, s4).transpose(1, 0, 2, 3)    # CBHW
    d1 = conv_transpose2d_cbhw(d_in, p["deconv1_w"], p["deconv1_b"], "relu")
    d2 = conv_transpose2d_cbhw(d1, p["deconv2_w"], p["deconv2_b"], "sigmoid")
    return jnp.transpose(d2, (1, 0, 2, 3))                                # NCHW


# --------------------------- pure-JAX reference ------------------------------

def ref_forward(x, y, p, image_size, std_channel):
    def conv(x, w, b, s, pad):
        out = jax.lax.conv_general_dilated(
            x, w, (s, s), [(pad, pad), (pad, pad)],
            dimension_numbers=("NCHW", "OIHW", "NCHW"))
        return out + b.reshape(1, -1, 1, 1)

    def deconv(x, w, b, s, pad):
        k = w.shape[-1]
        w_eq = jnp.flip(w, (-2, -1)).transpose(1, 0, 2, 3)
        out = jax.lax.conv_general_dilated(
            x, w_eq, (1, 1), [(k - 1 - pad, k - 1 - pad)] * 2,
            lhs_dilation=(s, s),
            dimension_numbers=("NCHW", "OIHW", "NCHW"))
        return out + b.reshape(1, -1, 1, 1)

    B = x.shape[0]
    h = jax.nn.relu(conv(x, p["conv1_w"], p["conv1_b"], 2, 1))
    h = jax.nn.relu(conv(h, p["conv2_w"], p["conv2_b"], 2, 1))
    z = h.reshape(B, -1) @ p["fc_enc_w"] + p["fc_enc_b"] + p["emb"][y]
    h = jax.nn.relu(z @ p["fc_dec_w"] + p["fc_dec_b"])
    s4 = image_size // 4
    h = h.reshape(B, 2 * std_channel, s4, s4)
    h = jax.nn.relu(deconv(h, p["deconv1_w"], p["deconv1_b"], 2, 1))
    return jax.nn.sigmoid(deconv(h, p["deconv2_w"], p["deconv2_b"], 2, 1))


# ----------------------------------- main ------------------------------------

if __name__ == "__main__":
    image_size, image_channel, std_channel = 16, 4, 8
    latent_dim, num_class, batch = 32, 10, 2

    key = jax.random.PRNGKey(0)
    ks = jax.random.split(key, 16)

    def rnd(k, shape):
        return jax.random.normal(k, shape, jnp.float32) * 0.05

    s4 = image_size // 4
    flat_dim = 2 * std_channel * s4 * s4

    # Linear weights are stored already transposed to (in, out); conv /
    # conv-transpose weights use PyTorch layouts.
    params = {
        "conv1_w": rnd(ks[0], (std_channel, image_channel, 4, 4)),
        "conv1_b": rnd(ks[1], (std_channel,)),
        "conv2_w": rnd(ks[2], (2 * std_channel, std_channel, 4, 4)),
        "conv2_b": rnd(ks[3], (2 * std_channel,)),
        "fc_enc_w": rnd(ks[4], (flat_dim, latent_dim)),
        "fc_enc_b": rnd(ks[5], (latent_dim,)),
        "emb": rnd(ks[6], (num_class, latent_dim)),
        "fc_dec_w": rnd(ks[7], (latent_dim, flat_dim)),
        "fc_dec_b": rnd(ks[8], (flat_dim,)),
        "deconv1_w": rnd(ks[9], (2 * std_channel, std_channel, 4, 4)),
        "deconv1_b": rnd(ks[10], (std_channel,)),
        "deconv2_w": rnd(ks[11], (std_channel, image_channel, 4, 4)),
        "deconv2_b": rnd(ks[12], (image_channel,)),
    }

    x = jax.random.normal(ks[13], (batch, image_channel, image_size, image_size),
                          jnp.float32)
    y = jax.random.randint(ks[14], (batch,), 0, num_class)

    fwd = jax.jit(functools.partial(eae_forward, image_size=image_size,
                                    std_channel=std_channel))
    out = jax.block_until_ready(fwd(x, y, params))

    assert out.shape == (batch, image_channel, image_size, image_size), out.shape
    assert out.dtype == jnp.float32

    ref = ref_forward(x, y, params, image_size, std_channel)
    err = float(jnp.max(jnp.abs(out - ref)))
    assert err < 5e-2, f"pallas vs reference mismatch: max abs err {err}"

    print("KERNEL_OK")
</pallas_src>

<mosaic_0001>
module attributes {stable_mosaic.version = 11 : i64} {
  func.func @_conv_mm_kernel(%arg0: i32, %arg1: memref<8x64xbf16, #tpu.memory_space<vmem>>, %arg2: memref<64x128xbf16, #tpu.memory_space<vmem>>, %arg3: memref<8x1xf32, #tpu.memory_space<vmem>>, %arg4: memref<8x128xf32, #tpu.memory_space<vmem>>) attributes {dimension_semantics = [#tpu.dimension_semantics<parallel>], iteration_bounds = array<i64: 1>, scalar_prefetch = 0 : i64, scratch_operands = 0 : i64, tpu.core_type = #tpu.core_type<tc>, window_params = [{pipeline_mode = #tpu.pipeline_mode<synchronous>, transform_indices = @transform_0, window_bounds = array<i64: 8, 64>}, {transform_indices = @transform_1, window_bounds = array<i64: 64, 128>}, {pipeline_mode = #tpu.pipeline_mode<synchronous>, transform_indices = @transform_2, window_bounds = array<i64: 8, 1>}, {transform_indices = @transform_3, window_bounds = array<i64: 8, 128>}]} {
    %c0 = arith.constant 0 : index
    %c0_0 = arith.constant 0 : index
    %0 = vector.load %arg1[%c0, %c0_0] : memref<8x64xbf16, #tpu.memory_space<vmem>>, vector<8x64xbf16>
    %c0_1 = arith.constant 0 : index
    %c0_2 = arith.constant 0 : index
    %1 = vector.load %arg2[%c0_1, %c0_2] : memref<64x128xbf16, #tpu.memory_space<vmem>>, vector<64x128xbf16>
    %cst = arith.constant dense<0.000000e+00> : vector<8x128xf32>
    %2 = tpu.matmul %0, %1, %cst {dimension_numbers = #tpu.dot_dimension_numbers<[1], [0], [0], [1], [0, 0, 1, 1], [], []>} : vector<8x64xbf16>, vector<64x128xbf16>, vector<8x128xf32> -> vector<8x128xf32>
    %c0_3 = arith.constant 0 : index
    %c0_4 = arith.constant 0 : index
    %3 = vector.load %arg3[%c0_3, %c0_4] : memref<8x1xf32, #tpu.memory_space<vmem>>, vector<8x1xf32>
    %4 = vector.broadcast %3 : vector<8x1xf32> to vector<8x128xf32>
    %5 = arith.addf %2, %4 : vector<8x128xf32>
    %cst_5 = arith.constant 0.000000e+00 : f32
    %6 = vector.broadcast %cst_5 : f32 to vector<8x128xf32>
    %7 = arith.maximumf %5, %6 : vector<8x128xf32>
    %c0_6 = arith.constant 0 : index
    %c0_7 = arith.constant 0 : index
    %8 = vector.load %arg4[%c0_6, %c0_7] : memref<8x128xf32, #tpu.memory_space<vmem>>, vector<8x128xf32>
    tpu.vector_store %arg4[%c0_6, %c0_7], %7 {strides = array<i32>} : memref<8x128xf32, #tpu.memory_space<vmem>>, vector<8x128xf32>,
    return
  }
  func.func @transform_0(%arg0: i32) -> (i32, i32) {
    %c0_i32 = arith.constant 0 : i32
    %c0_i32_0 = arith.constant 0 : i32
    %c0_i32_1 = arith.constant 0 : i32
    return %c0_i32, %c0_i32_0 : i32, i32
  }
  func.func @transform_1(%arg0: i32) -> (i32, i32) {
    %c0_i32 = arith.constant 0 : i32
    %c0_i32_0 = arith.constant 0 : i32
    return %c0_i32, %arg0 : i32, i32
  }
  func.func @transform_2(%arg0: i32) -> (i32, i32) {
    %c0_i32 = arith.constant 0 : i32
    %c0_i32_0 = arith.constant 0 : i32
    %c0_i32_1 = arith.constant 0 : i32
    return %c0_i32, %c0_i32_0 : i32, i32
  }
  func.func @transform_3(%arg0: i32) -> (i32, i32) {
    %c0_i32 = arith.constant 0 : i32
    %c0_i32_0 = arith.constant 0 : i32
    return %c0_i32, %arg0 : i32, i32
  }
}

module attributes {stable_mosaic.version = 11 : i64} {
  func.func @_conv_mm_kernel(%arg0: i32, %arg1: memref<16x128xbf16, #tpu.memory_space<vmem>>, %arg2: memref<128x32xbf16, #tpu.memory_space<vmem>>, %arg3: memref<16x1xf32, #tpu.memory_space<vmem>>, %arg4: memref<16x32xf32, #tpu.memory_space<vmem>>) attributes {dimension_semantics = [#tpu.dimension_semantics<parallel>], iteration_bounds = array<i64: 1>, scalar_prefetch = 0 : i64, scratch_operands = 0 : i64, tpu.core_type = #tpu.core_type<tc>, window_params = [{pipeline_mode = #tpu.pipeline_mode<synchronous>, transform_indices = @transform_0, window_bounds = array<i64: 16, 128>}, {transform_indices = @transform_1, window_bounds = array<i64: 128, 32>}, {pipeline_mode = #tpu.pipeline_mode<synchronous>, transform_indices = @transform_2, window_bounds = array<i64: 16, 1>}, {transform_indices = @transform_3, window_bounds = array<i64: 16, 32>}]} {
    %c0 = arith.constant 0 : index
    %c0_0 = arith.constant 0 : index
    %0 = vector.load %arg1[%c0, %c0_0] : memref<16x128xbf16, #tpu.memory_space<vmem>>, vector<16x128xbf16>
    %c0_1 = arith.constant 0 : index
    %c0_2 = arith.constant 0 : index
    %1 = vector.load %arg2[%c0_1, %c0_2] : memref<128x32xbf16, #tpu.memory_space<vmem>>, vector<128x32xbf16>
    %cst = arith.constant dense<0.000000e+00> : vector<16x32xf32>
    %2 = tpu.matmul %0, %1, %cst {dimension_numbers = #tpu.dot_dimension_numbers<[1], [0], [0], [1], [0, 0, 1, 1], [], []>} : vector<16x128xbf16>, vector<128x32xbf16>, vector<16x32xf32> -> vector<16x32xf32>
    %c0_3 = arith.constant 0 : index
    %c0_4 = arith.constant 0 : index
    %3 = vector.load %arg3[%c0_3, %c0_4] : memref<16x1xf32, #tpu.memory_space<vmem>>, vector<16x1xf32>
    %4 = vector.broadcast %3 : vector<16x1xf32> to vector<16x32xf32>
    %5 = arith.addf %2, %4 : vector<16x32xf32>
    %cst_5 = arith.constant 0.000000e+00 : f32
    %6 = vector.broadcast %cst_5 : f32 to vector<16x32xf32>
    %7 = arith.maximumf %5, %6 : vector<16x32xf32>
    %c0_6 = arith.constant 0 : index
    %c0_7 = arith.constant 0 : index
    %8 = vector.load %arg4[%c0_6, %c0_7] : memref<16x32xf32, #tpu.memory_space<vmem>>, vector<16x32xf32>
    tpu.vector_store %arg4[%c0_6, %c0_7], %7 {strides = array<i32>} : memref<16x32xf32, #tpu.memory_space<vmem>>, vector<16x32xf32>,
    return
  }
  func.func @transform_0(%arg0: i32) -> (i32, i32) {
    %c0_i32 = arith.constant 0 : i32
    %c0_i32_0 = arith.constant 0 : i32
    %c0_i32_1 = arith.constant 0 : i32
    return %c0_i32, %c0_i32_0 : i32, i32
  }
  func.func @transform_1(%arg0: i32) -> (i32, i32) {
    %c0_i32 = arith.constant 0 : i32
    %c0_i32_0 = arith.constant 0 : i32
    return %c0_i32, %arg0 : i32, i32
  }
  func.func @transform_2(%arg0: i32) -> (i32, i32) {
    %c0_i32 = arith.constant 0 : i32
    %c0_i32_0 = arith.constant 0 : i32
    %c0_i32_1 = arith.constant 0 : i32
    return %c0_i32, %c0_i32_0 : i32, i32
  }
  func.func @transform_3(%arg0: i32) -> (i32, i32) {
    %c0_i32 = arith.constant 0 : i32
    %c0_i32_0 = arith.constant 0 : i32
    return %c0_i32, %arg0 : i32, i32
  }
}

module attributes {stable_mosaic.version = 11 : i64} {
  func.func @_latent_fused_kernel(%arg0: i32, %arg1: memref<2x256xbf16, #tpu.memory_space<vmem>>, %arg2: memref<256x32xbf16, #tpu.memory_space<vmem>>, %arg3: memref<1x32xf32, #tpu.memory_space<vmem>>, %arg4: memref<2x32xf32, #tpu.memory_space<vmem>>, %arg5: memref<32x256xbf16, #tpu.memory_space<vmem>>, %arg6: memref<1x256xf32, #tpu.memory_space<vmem>>, %arg7: memref<2x256xf32, #tpu.memory_space<vmem>>) attributes {dimension_semantics = [#tpu.dimension_semantics<arbitrary>], iteration_bounds = array<i64: 1>, scalar_prefetch = 0 : i64, scratch_operands = 0 : i64, tpu.core_type = #tpu.core_type<tc>, window_params = [{pipeline_mode = #tpu.pipeline_mode<synchronous>, transform_indices = @transform_0, window_bounds = array<i64: 2, 256>}, {pipeline_mode = #tpu.pipeline_mode<synchronous>, transform_indices = @transform_1, window_bounds = array<i64: 256, 32>}, {pipeline_mode = #tpu.pipeline_mode<synchronous>, transform_indices = @transform_2, window_bounds = array<i64: 1, 32>}, {pipeline_mode = #tpu.pipeline_mode<synchronous>, transform_indices = @transform_3, window_bounds = array<i64: 2, 32>}, {pipeline_mode = #tpu.pipeline_mode<synchronous>, transform_indices = @transform_4, window_bounds = array<i64: 32, 256>}, {pipeline_mode = #tpu.pipeline_mode<synchronous>, transform_indices = @transform_5, window_bounds = array<i64: 1, 256>}, {pipeline_mode = #tpu.pipeline_mode<synchronous>, transform_indices = @transform_6, window_bounds = array<i64: 2, 256>}]} {
    %c0 = arith.constant 0 : index
    %c0_0 = arith.constant 0 : index
    %0 = vector.load %arg1[%c0, %c0_0] : memref<2x256xbf16, #tpu.memory_space<vmem>>, vector<2x256xbf16>
    %c0_1 = arith.constant 0 : index
    %c0_2 = arith.constant 0 : index
    %1 = vector.load %arg2[%c0_1, %c0_2] : memref<256x32xbf16, #tpu.memory_space<vmem>>, vector<256x32xbf16>
    %cst = arith.constant dense<0.000000e+00> : vector<2x32xf32>
    %2 = tpu.matmul %0, %1, %cst {dimension_numbers = #tpu.dot_dimension_numbers<[1], [0], [0], [1], [0, 0, 1, 1], [], []>} : vector<2x256xbf16>, vector<256x32xbf16>, vector<2x32xf32> -> vector<2x32xf32>
    %c0_3 = arith.constant 0 : index
    %c0_4 = arith.constant 0 : index
    %3 = vector.load %arg3[%c0_3, %c0_4] : memref<1x32xf32, #tpu.memory_space<vmem>>, vector<1x32xf32>
    %4 = vector.broadcast %3 : vector<1x32xf32> to vector<2x32xf32>
    %5 = arith.addf %2, %4 : vector<2x32xf32>
    %c0_5 = arith.constant 0 : index
    %c0_6 = arith.constant 0 : index
    %6 = vector.load %arg4[%c0_5, %c0_6] : memref<2x32xf32, #tpu.memory_space<vmem>>, vector<2x32xf32>
    %7 = arith.addf %5, %6 : vector<2x32xf32>
    %8 = arith.truncf %7 : vector<2x32xf32> to vector<2x32xbf16>
    %c0_7 = arith.constant 0 : index
    %c0_8 = arith.constant 0 : index
    %9 = vector.load %arg5[%c0_7, %c0_8] : memref<32x256xbf16, #tpu.memory_space<vmem>>, vector<32x256xbf16>
    %cst_9 = arith.constant dense<0.000000e+00> : vector<2x256xf32>
    %10 = tpu.matmul %8, %9, %cst_9 {dimension_numbers = #tpu.dot_dimension_numbers<[1], [0], [0], [1], [0, 0, 1, 1], [], []>} : vector<2x32xbf16>, vector<32x256xbf16>, vector<2x256xf32> -> vector<2x256xf32>
    %c0_10 = arith.constant 0 : index
    %c0_11 = arith.constant 0 : index
    %11 = vector.load %arg6[%c0_10, %c0_11] : memref<1x256xf32, #tpu.memory_space<vmem>>, vector<1x256xf32>
    %12 = vector.broadcast %11 : vector<1x256xf32> to vector<2x256xf32>
    %13 = arith.addf %10, %12 : vector<2x256xf32>
    %cst_12 = arith.constant 0.000000e+00 : f32
    %14 = vector.broadcast %cst_12 : f32 to vector<2x256xf32>
    %15 = arith.maximumf %13, %14 : vector<2x256xf32>
    %c0_13 = arith.constant 0 : index
    %c0_14 = arith.constant 0 : index
    %16 = vector.load %arg7[%c0_13, %c0_14] : memref<2x256xf32, #tpu.memory_space<vmem>>, vector<2x256xf32>
    tpu.vector_store %arg7[%c0_13, %c0_14], %15 {strides = array<i32>} : memref<2x256xf32, #tpu.memory_space<vmem>>, vector<2x256xf32>,
    return
  }
  func.func @transform_0(%arg0: i32) -> (i32, i32) {
    %c0_i32 = arith.constant 0 : i32
    %c0_i32_0 = arith.constant 0 : i32
    %c0_i32_1 = arith.constant 0 : i32
    return %c0_i32, %c0_i32_0 : i32, i32
  }
  func.func @transform_1(%arg0: i32) -> (i32, i32) {
    %c0_i32 = arith.constant 0 : i32
    %c0_i32_0 = arith.constant 0 : i32
    %c0_i32_1 = arith.constant 0 : i32
    return %c0_i32, %c0_i32_0 : i32, i32
  }
  func.func @transform_2(%arg0: i32) -> (i32, i32) {
    %c0_i32 = arith.constant 0 : i32
    %c0_i32_0 = arith.constant 0 : i32
    %c0_i32_1 = arith.constant 0 : i32
    return %c0_i32, %c0_i32_0 : i32, i32
  }
  func.func @transform_3(%arg0: i32) -> (i32, i32) {
    %c0_i32 = arith.constant 0 : i32
    %c0_i32_0 = arith.constant 0 : i32
    %c0_i32_1 = arith.constant 0 : i32
    return %c0_i32, %c0_i32_0 : i32, i32
  }
  func.func @transform_4(%arg0: i32) -> (i32, i32) {
    %c0_i32 = arith.constant 0 : i32
    %c0_i32_0 = arith.constant 0 : i32
    %c0_i32_1 = arith.constant 0 : i32
    return %c0_i32, %c0_i32_0 : i32, i32
  }
  func.func @transform_5(%arg0: i32) -> (i32, i32) {
    %c0_i32 = arith.constant 0 : i32
    %c0_i32_0 = arith.constant 0 : i32
    %c0_i32_1 = arith.constant 0 : i32
    return %c0_i32, %c0_i32_0 : i32, i32
  }
  func.func @transform_6(%arg0: i32) -> (i32, i32) {
    %c0_i32 = arith.constant 0 : i32
    %c0_i32_0 = arith.constant 0 : i32
    %c0_i32_1 = arith.constant 0 : i32
    return %c0_i32, %c0_i32_0 : i32, i32
  }
}

module attributes {stable_mosaic.version = 11 : i64} {
  func.func @_deconv_phase_kernel(%arg0: i32, %arg1: memref<4x8x64xbf16, #tpu.memory_space<vmem>>, %arg2: memref<4x64x32xbf16, #tpu.memory_space<vmem>>, %arg3: memref<8x1xf32, #tpu.memory_space<vmem>>, %arg4: memref<4x8x32xf32, #tpu.memory_space<vmem>>) attributes {dimension_semantics = [#tpu.dimension_semantics<arbitrary>], iteration_bounds = array<i64: 1>, scalar_prefetch = 0 : i64, scratch_operands = 0 : i64, tpu.core_type = #tpu.core_type<tc>, window_params = [{pipeline_mode = #tpu.pipeline_mode<synchronous>, transform_indices = @transform_0, window_bounds = array<i64: 4, 8, 64>}, {pipeline_mode = #tpu.pipeline_mode<synchronous>, transform_indices = @transform_1, window_bounds = array<i64: 4, 64, 32>}, {pipeline_mode = #tpu.pipeline_mode<synchronous>, transform_indices = @transform_2, window_bounds = array<i64: 8, 1>}, {pipeline_mode = #tpu.pipeline_mode<synchronous>, transform_indices = @transform_3, window_bounds = array<i64: 4, 8, 32>}]} {
    %c0 = arith.constant 0 : index
    %c0_0 = arith.constant 0 : index
    %c0_1 = arith.constant 0 : index
    %0 = vector.load %arg1[%c0, %c0_0, %c0_1] : memref<4x8x64xbf16, #tpu.memory_space<vmem>>, vector<1x8x64xbf16>
    %1 = vector.shape_cast %0 : vector<1x8x64xbf16> to vector<8x64xbf16>
    %c0_2 = arith.constant 0 : index
    %c0_3 = arith.constant 0 : index
    %c0_4 = arith.constant 0 : index
    %2 = vector.load %arg2[%c0_2, %c0_3, %c0_4] : memref<4x64x32xbf16, #tpu.memory_space<vmem>>, vector<1x64x32xbf16>
    %3 = vector.shape_cast %2 : vector<1x64x32xbf16> to vector<64x32xbf16>
    %cst = arith.constant dense<0.000000e+00> : vector<8x32xf32>
    %4 = tpu.matmul %1, %3, %cst {dimension_numbers = #tpu.dot_dimension_numbers<[1], [0], [0], [1], [0, 0, 1, 1], [], []>} : vector<8x64xbf16>, vector<64x32xbf16>, vector<8x32xf32> -> vector<8x32xf32>
    %c0_5 = arith.constant 0 : index
    %c0_6 = arith.constant 0 : index
    %5 = vector.load %arg3[%c0_5, %c0_6] : memref<8x1xf32, #tpu.memory_space<vmem>>, vector<8x1xf32>
    %6 = vector.broadcast %5 : vector<8x1xf32> to vector<8x32xf32>
    %7 = arith.addf %4, %6 : vector<8x32xf32>
    %cst_7 = arith.constant 0.000000e+00 : f32
    %8 = vector.broadcast %cst_7 : f32 to vector<8x32xf32>
    %9 = arith.maximumf %7, %8 : vector<8x32xf32>
    %c0_8 = arith.constant 0 : index
    %c0_9 = arith.constant 0 : index
    %c0_10 = arith.constant 0 : index
    %10 = vector.load %arg4[%c0_8, %c0_9, %c0_10] : memref<4x8x32xf32, #tpu.memory_space<vmem>>, vector<1x8x32xf32>
    %11 = vector.shape_cast %10 : vector<1x8x32xf32> to vector<8x32xf32>
    %12 = vector.shape_cast %9 : vector<8x32xf32> to vector<1x8x32xf32>
    tpu.vector_store %arg4[%c0_8, %c0_9, %c0_10], %12 {strides = array<i32>} : memref<4x8x32xf32, #tpu.memory_space<vmem>>, vector<1x8x32xf32>,
    %c1 = arith.constant 1 : index
    %c0_11 = arith.constant 0 : index
    %c0_12 = arith.constant 0 : index
    %13 = vector.load %arg1[%c1, %c0_11, %c0_12] : memref<4x8x64xbf16, #tpu.memory_space<vmem>>, vector<1x8x64xbf16>
    %14 = vector.shape_cast %13 : vector<1x8x64xbf16> to vector<8x64xbf16>
    %c1_13 = arith.constant 1 : index
    %c0_14 = arith.constant 0 : index
    %c0_15 = arith.constant 0 : index
    %15 = vector.load %arg2[%c1_13, %c0_14, %c0_15] : memref<4x64x32xbf16, #tpu.memory_space<vmem>>, vector<1x64x32xbf16>
    %16 = vector.shape_cast %15 : vector<1x64x32xbf16> to vector<64x32xbf16>
    %cst_16 = arith.constant dense<0.000000e+00> : vector<8x32xf32>
    %17 = tpu.matmul %14, %16, %cst_16 {dimension_numbers = #tpu.dot_dimension_numbers<[1], [0], [0], [1], [0, 0, 1, 1], [], []>} : vector<8x64xbf16>, vector<64x32xbf16>, vector<8x32xf32> -> vector<8x32xf32>
    %c0_17 = arith.constant 0 : index
    %c0_18 = arith.constant 0 : index
    %18 = vector.load %arg3[%c0_17, %c0_18] : memref<8x1xf32, #tpu.memory_space<vmem>>, vector<8x1xf32>
    %19 = vector.broadcast %18 : vector<8x1xf32> to vector<8x32xf32>
    %20 = arith.addf %17, %19 : vector<8x32xf32>
    %cst_19 = arith.constant 0.000000e+00 : f32
    %21 = vector.broadcast %cst_19 : f32 to vector<8x32xf32>
    %22 = arith.maximumf %20, %21 : vector<8x32xf32>
    %c1_20 = arith.constant 1 : index
    %c0_21 = arith.constant 0 : index
    %c0_22 = arith.constant 0 : index
    %23 = vector.load %arg4[%c1_20, %c0_21, %c0_22] : memref<4x8x32xf32, #tpu.memory_space<vmem>>, vector<1x8x32xf32>
    %24 = vector.shape_cast %23 : vector<1x8x32xf32> to vector<8x32xf32>
    %25 = vector.shape_cast %22 : vector<8x32xf32> to vector<1x8x32xf32>
    tpu.vector_store %arg4[%c1_20, %c0_21, %c0_22], %25 {strides = array<i32>} : memref<4x8x32xf32, #tpu.memory_space<vmem>>, vector<1x8x32xf32>,
    %c2 = arith.constant 2 : index
    %c0_23 = arith.constant 0 : index
    %c0_24 = arith.constant 0 : index
    %26 = vector.load %arg1[%c2, %c0_23, %c0_24] : memref<4x8x64xbf16, #tpu.memory_space<vmem>>, vector<1x8x64xbf16>
    %27 = vector.shape_cast %26 : vector<1x8x64xbf16> to vector<8x64xbf16>
    %c2_25 = arith.constant 2 : index
    %c0_26 = arith.constant 0 : index
    %c0_27 = arith.constant 0 : index
    %28 = vector.load %arg2[%c2_25, %c0_26, %c0_27] : memref<4x64x32xbf16, #tpu.memory_space<vmem>>, vector<1x64x32xbf16>
    %29 = vector.shape_cast %28 : vector<1x64x32xbf16> to vector<64x32xbf16>
    %cst_28 = arith.constant dense<0.000000e+00> : vector<8x32xf32>
    %30 = tpu.matmul %27, %29, %cst_28 {dimension_numbers = #tpu.dot_dimension_numbers<[1], [0], [0], [1], [0, 0, 1, 1], [], []>} : vector<8x64xbf16>, vector<64x32xbf16>, vector<8x32xf32> -> vector<8x32xf32>
    %c0_29 = arith.constant 0 : index
    %c0_30 = arith.constant 0 : index
    %31 = vector.load %arg3[%c0_29, %c0_30] : memref<8x1xf32, #tpu.memory_space<vmem>>, vector<8x1xf32>
    %32 = vector.broadcast %31 : vector<8x1xf32> to vector<8x32xf32>
    %33 = arith.addf %30, %32 : vector<8x32xf32>
    %cst_31 = arith.constant 0.000000e+00 : f32
    %34 = vector.broadcast %cst_31 : f32 to vector<8x32xf32>
    %35 = arith.maximumf %33, %34 : vector<8x32xf32>
    %c2_32 = arith.constant 2 : index
    %c0_33 = arith.constant 0 : index
    %c0_34 = arith.constant 0 : index
    %36 = vector.load %arg4[%c2_32, %c0_33, %c0_34] : memref<4x8x32xf32, #tpu.memory_space<vmem>>, vector<1x8x32xf32>
    %37 = vector.shape_cast %36 : vector<1x8x32xf32> to vector<8x32xf32>
    %38 = vector.shape_cast %35 : vector<8x32xf32> to vector<1x8x32xf32>
    tpu.vector_store %arg4[%c2_32, %c0_33, %c0_34], %38 {strides = array<i32>} : memref<4x8x32xf32, #tpu.memory_space<vmem>>, vector<1x8x32xf32>,
    %c3 = arith.constant 3 : index
    %c0_35 = arith.constant 0 : index
    %c0_36 = arith.constant 0 : index
    %39 = vector.load %arg1[%c3, %c0_35, %c0_36] : memref<4x8x64xbf16, #tpu.memory_space<vmem>>, vector<1x8x64xbf16>
    %40 = vector.shape_cast %39 : vector<1x8x64xbf16> to vector<8x64xbf16>
    %c3_37 = arith.constant 3 : index
    %c0_38 = arith.constant 0 : index
    %c0_39 = arith.constant 0 : index
    %41 = vector.load %arg2[%c3_37, %c0_38, %c0_39] : memref<4x64x32xbf16, #tpu.memory_space<vmem>>, vector<1x64x32xbf16>
    %42 = vector.shape_cast %41 : vector<1x64x32xbf16> to vector<64x32xbf16>
    %cst_40 = arith.constant dense<0.000000e+00> : vector<8x32xf32>
    %43 = tpu.matmul %40, %42, %cst_40 {dimension_numbers = #tpu.dot_dimension_numbers<[1], [0], [0], [1], [0, 0, 1, 1], [], []>} : vector<8x64xbf16>, vector<64x32xbf16>, vector<8x32xf32> -> vector<8x32xf32>
    %c0_41 = arith.constant 0 : index
    %c0_42 = arith.constant 0 : index
    %44 = vector.load %arg3[%c0_41, %c0_42] : memref<8x1xf32, #tpu.memory_space<vmem>>, vector<8x1xf32>
    %45 = vector.broadcast %44 : vector<8x1xf32> to vector<8x32xf32>
    %46 = arith.addf %43, %45 : vector<8x32xf32>
    %cst_43 = arith.constant 0.000000e+00 : f32
    %47 = vector.broadcast %cst_43 : f32 to vector<8x32xf32>
    %48 = arith.maximumf %46, %47 : vector<8x32xf32>
    %c3_44 = arith.constant 3 : index
    %c0_45 = arith.constant 0 : index
    %c0_46 = arith.constant 0 : index
    %49 = vector.load %arg4[%c3_44, %c0_45, %c0_46] : memref<4x8x32xf32, #tpu.memory_space<vmem>>, vector<1x8x32xf32>
    %50 = vector.shape_cast %49 : vector<1x8x32xf32> to vector<8x32xf32>
    %51 = vector.shape_cast %48 : vector<8x32xf32> to vector<1x8x32xf32>
    tpu.vector_store %arg4[%c3_44, %c0_45, %c0_46], %51 {strides = array<i32>} : memref<4x8x32xf32, #tpu.memory_space<vmem>>, vector<1x8x32xf32>,
    return
  }
  func.func @transform_0(%arg0: i32) -> (i32, i32, i32) {
    %c0_i32 = arith.constant 0 : i32
    %c0_i32_0 = arith.constant 0 : i32
    %c0_i32_1 = arith.constant 0 : i32
    %c0_i32_2 = arith.constant 0 : i32
    return %c0_i32, %c0_i32_0, %c0_i32_1 : i32, i32, i32
  }
  func.func @transform_1(%arg0: i32) -> (i32, i32, i32) {
    %c0_i32 = arith.constant 0 : i32
    %c0_i32_0 = arith.constant 0 : i32
    %c0_i32_1 = arith.constant 0 : i32
    %c0_i32_2 = arith.constant 0 : i32
    return %c0_i32, %c0_i32_0, %c0_i32_1 : i32, i32, i32
  }
  func.func @transform_2(%arg0: i32) -> (i32, i32) {
    %c0_i32 = arith.constant 0 : i32
    %c0_i32_0 = arith.constant 0 : i32
    %c0_i32_1 = arith.constant 0 : i32
    return %c0_i32, %c0_i32_0 : i32, i32
  }
  func.func @transform_3(%arg0: i32) -> (i32, i32, i32) {
    %c0_i32 = arith.constant 0 : i32
    %c0_i32_0 = arith.constant 0 : i32
    %c0_i32_1 = arith.constant 0 : i32
    %c0_i32_2 = arith.constant 0 : i32
    return %c0_i32, %c0_i32_0, %c0_i32_1 : i32, i32, i32
  }
}

module attributes {stable_mosaic.version = 11 : i64} {
  func.func @_deconv_phase_kernel(%arg0: i32, %arg1: memref<4x4x32xbf16, #tpu.memory_space<vmem>>, %arg2: memref<4x32x128xbf16, #tpu.memory_space<vmem>>, %arg3: memref<4x1xf32, #tpu.memory_space<vmem>>, %arg4: memref<4x4x128xf32, #tpu.memory_space<vmem>>) attributes {dimension_semantics = [#tpu.dimension_semantics<arbitrary>], iteration_bounds = array<i64: 1>, scalar_prefetch = 0 : i64, scratch_operands = 0 : i64, tpu.core_type = #tpu.core_type<tc>, window_params = [{pipeline_mode = #tpu.pipeline_mode<synchronous>, transform_indices = @transform_0, window_bounds = array<i64: 4, 4, 32>}, {pipeline_mode = #tpu.pipeline_mode<synchronous>, transform_indices = @transform_1, window_bounds = array<i64: 4, 32, 128>}, {pipeline_mode = #tpu.pipeline_mode<synchronous>, transform_indices = @transform_2, window_bounds = array<i64: 4, 1>}, {pipeline_mode = #tpu.pipeline_mode<synchronous>, transform_indices = @transform_3, window_bounds = array<i64: 4, 4, 128>}]} {
    %c0 = arith.constant 0 : index
    %c0_0 = arith.constant 0 : index
    %c0_1 = arith.constant 0 : index
    %0 = vector.load %arg1[%c0, %c0_0, %c0_1] : memref<4x4x32xbf16, #tpu.memory_space<vmem>>, vector<1x4x32xbf16>
    %1 = vector.shape_cast %0 : vector<1x4x32xbf16> to vector<4x32xbf16>
    %c0_2 = arith.constant 0 : index
    %c0_3 = arith.constant 0 : index
    %c0_4 = arith.constant 0 : index
    %2 = vector.load %arg2[%c0_2, %c0_3, %c0_4] : memref<4x32x128xbf16, #tpu.memory_space<vmem>>, vector<1x32x128xbf16>
    %3 = vector.shape_cast %2 : vector<1x32x128xbf16> to vector<32x128xbf16>
    %cst = arith.constant dense<0.000000e+00> : vector<4x128xf32>
    %4 = tpu.matmul %1, %3, %cst {dimension_numbers = #tpu.dot_dimension_numbers<[1], [0], [0], [1], [0, 0, 1, 1], [], []>} : vector<4x32xbf16>, vector<32x128xbf16>, vector<4x128xf32> -> vector<4x128xf32>
    %c0_5 = arith.constant 0 : index
    %c0_6 = arith.constant 0 : index
    %5 = vector.load %arg3[%c0_5, %c0_6] : memref<4x1xf32, #tpu.memory_space<vmem>>, vector<4x1xf32>
    %6 = vector.broadcast %5 : vector<4x1xf32> to vector<4x128xf32>
    %7 = arith.addf %4, %6 : vector<4x128xf32>
    %cst_7 = arith.constant 0.000000e+00 : f32
    %8 = vector.broadcast %cst_7 : f32 to vector<4x128xf32>
    %9 = arith.subf %8, %7 : vector<4x128xf32>
    %10 = math.exp %9 : vector<4x128xf32>
    %cst_8 = arith.constant 1.000000e+00 : f32
    %11 = vector.broadcast %cst_8 : f32 to vector<4x128xf32>
    %12 = arith.addf %11, %10 : vector<4x128xf32>
    %13 = tpu.reciprocal %12 {approx = true} : vector<4x128xf32> -> vector<4x128xf32>
    %c0_9 = arith.constant 0 : index
    %c0_10 = arith.constant 0 : index
    %c0_11 = arith.constant 0 : index
    %14 = vector.load %arg4[%c0_9, %c0_10, %c0_11] : memref<4x4x128xf32, #tpu.memory_space<vmem>>, vector<1x4x128xf32>
    %15 = vector.shape_cast %14 : vector<1x4x128xf32> to vector<4x128xf32>
    %16 = vector.shape_cast %13 : vector<4x128xf32> to vector<1x4x128xf32>
    tpu.vector_store %arg4[%c0_9, %c0_10, %c0_11], %16 {strides = array<i32>} : memref<4x4x128xf32, #tpu.memory_space<vmem>>, vector<1x4x128xf32>,
    %c1 = arith.constant 1 : index
    %c0_12 = arith.constant 0 : index
    %c0_13 = arith.constant 0 : index
    %17 = vector.load %arg1[%c1, %c0_12, %c0_13] : memref<4x4x32xbf16, #tpu.memory_space<vmem>>, vector<1x4x32xbf16>
    %18 = vector.shape_cast %17 : vector<1x4x32xbf16> to vector<4x32xbf16>
    %c1_14 = arith.constant 1 : index
    %c0_15 = arith.constant 0 : index
    %c0_16 = arith.constant 0 : index
    %19 = vector.load %arg2[%c1_14, %c0_15, %c0_16] : memref<4x32x128xbf16, #tpu.memory_space<vmem>>, vector<1x32x128xbf16>
    %20 = vector.shape_cast %19 : vector<1x32x128xbf16> to vector<32x128xbf16>
    %cst_17 = arith.constant dense<0.000000e+00> : vector<4x128xf32>
    %21 = tpu.matmul %18, %20, %cst_17 {dimension_numbers = #tpu.dot_dimension_numbers<[1], [0], [0], [1], [0, 0, 1, 1], [], []>} : vector<4x32xbf16>, vector<32x128xbf16>, vector<4x128xf32> -> vector<4x128xf32>
    %c0_18 = arith.constant 0 : index
    %c0_19 = arith.constant 0 : index
    %22 = vector.load %arg3[%c0_18, %c0_19] : memref<4x1xf32, #tpu.memory_space<vmem>>, vector<4x1xf32>
    %23 = vector.broadcast %22 : vector<4x1xf32> to vector<4x128xf32>
    %24 = arith.addf %21, %23 : vector<4x128xf32>
    %cst_20 = arith.constant 0.000000e+00 : f32
    %25 = vector.broadcast %cst_20 : f32 to vector<4x128xf32>
    %26 = arith.subf %25, %24 : vector<4x128xf32>
    %27 = math.exp %26 : vector<4x128xf32>
    %cst_21 = arith.constant 1.000000e+00 : f32
    %28 = vector.broadcast %cst_21 : f32 to vector<4x128xf32>
    %29 = arith.addf %28, %27 : vector<4x128xf32>
    %30 = tpu.reciprocal %29 {approx = true} : vector<4x128xf32> -> vector<4x128xf32>
    %c1_22 = arith.constant 1 : index
    %c0_23 = arith.constant 0 : index
    %c0_24 = arith.constant 0 : index
    %31 = vector.load %arg4[%c1_22, %c0_23, %c0_24] : memref<4x4x128xf32, #tpu.memory_space<vmem>>, vector<1x4x128xf32>
    %32 = vector.shape_cast %31 : vector<1x4x128xf32> to vector<4x128xf32>
    %33 = vector.shape_cast %30 : vector<4x128xf32> to vector<1x4x128xf32>
    tpu.vector_store %arg4[%c1_22, %c0_23, %c0_24], %33 {strides = array<i32>} : memref<4x4x128xf32, #tpu.memory_space<vmem>>, vector<1x4x128xf32>,
    %c2 = arith.constant 2 : index
    %c0_25 = arith.constant 0 : index
    %c0_26 = arith.constant 0 : index
    %34 = vector.load %arg1[%c2, %c0_25, %c0_26] : memref<4x4x32xbf16, #tpu.memory_space<vmem>>, vector<1x4x32xbf16>
    %35 = vector.shape_cast %34 : vector<1x4x32xbf16> to vector<4x32xbf16>
    %c2_27 = arith.constant 2 : index
    %c0_28 = arith.constant 0 : index
    %c0_29 = arith.constant 0 : index
    %36 = vector.load %arg2[%c2_27, %c0_28, %c0_29] : memref<4x32x128xbf16, #tpu.memory_space<vmem>>, vector<1x32x128xbf16>
    %37 = vector.shape_cast %36 : vector<1x32x128xbf16> to vector<32x128xbf16>
    %cst_30 = arith.constant dense<0.000000e+00> : vector<4x128xf32>
    %38 = tpu.matmul %35, %37, %cst_30 {dimension_numbers = #tpu.dot_dimension_numbers<[1], [0], [0], [1], [0, 0, 1, 1], [], []>} : vector<4x32xbf16>, vector<32x128xbf16>, vector<4x128xf32> -> vector<4x128xf32>
    %c0_31 = arith.constant 0 : index
    %c0_32 = arith.constant 0 : index
    %39 = vector.load %arg3[%c0_31, %c0_32] : memref<4x1xf32, #tpu.memory_space<vmem>>, vector<4x1xf32>
    %40 = vector.broadcast %39 : vector<4x1xf32> to vector<4x128xf32>
    %41 = arith.addf %38, %40 : vector<4x128xf32>
    %cst_33 = arith.constant 0.000000e+00 : f32
    %42 = vector.broadcast %cst_33 : f32 to vector<4x128xf32>
    %43 = arith.subf %42, %41 : vector<4x128xf32>
    %44 = math.exp %43 : vector<4x128xf32>
    %cst_34 = arith.constant 1.000000e+00 : f32
    %45 = vector.broadcast %cst_34 : f32 to vector<4x128xf32>
    %46 = arith.addf %45, %44 : vector<4x128xf32>
    %47 = tpu.reciprocal %46 {approx = true} : vector<4x128xf32> -> vector<4x128xf32>
    %c2_35 = arith.constant 2 : index
    %c0_36 = arith.constant 0 : index
    %c0_37 = arith.constant 0 : index
    %48 = vector.load %arg4[%c2_35, %c0_36, %c0_37] : memref<4x4x128xf32, #tpu.memory_space<vmem>>, vector<1x4x128xf32>
    %49 = vector.shape_cast %48 : vector<1x4x128xf32> to vector<4x128xf32>
    %50 = vector.shape_cast %47 : vector<4x128xf32> to vector<1x4x128xf32>
    tpu.vector_store %arg4[%c2_35, %c0_36, %c0_37], %50 {strides = array<i32>} : memref<4x4x128xf32, #tpu.memory_space<vmem>>, vector<1x4x128xf32>,
    %c3 = arith.constant 3 : index
    %c0_38 = arith.constant 0 : index
    %c0_39 = arith.constant 0 : index
    %51 = vector.load %arg1[%c3, %c0_38, %c0_39] : memref<4x4x32xbf16, #tpu.memory_space<vmem>>, vector<1x4x32xbf16>
    %52 = vector.shape_cast %51 : vector<1x4x32xbf16> to vector<4x32xbf16>
    %c3_40 = arith.constant 3 : index
    %c0_41 = arith.constant 0 : index
    %c0_42 = arith.constant 0 : index
    %53 = vector.load %arg2[%c3_40, %c0_41, %c0_42] : memref<4x32x128xbf16, #tpu.memory_space<vmem>>, vector<1x32x128xbf16>
    %54 = vector.shape_cast %53 : vector<1x32x128xbf16> to vector<32x128xbf16>
    %cst_43 = arith.constant dense<0.000000e+00> : vector<4x128xf32>
    %55 = tpu.matmul %52, %54, %cst_43 {dimension_numbers = #tpu.dot_dimension_numbers<[1], [0], [0], [1], [0, 0, 1, 1], [], []>} : vector<4x32xbf16>, vector<32x128xbf16>, vector<4x128xf32> -> vector<4x128xf32>
    %c0_44 = arith.constant 0 : index
    %c0_45 = arith.constant 0 : index
    %56 = vector.load %arg3[%c0_44, %c0_45] : memref<4x1xf32, #tpu.memory_space<vmem>>, vector<4x1xf32>
    %57 = vector.broadcast %56 : vector<4x1xf32> to vector<4x128xf32>
    %58 = arith.addf %55, %57 : vector<4x128xf32>
    %cst_46 = arith.constant 0.000000e+00 : f32
    %59 = vector.broadcast %cst_46 : f32 to vector<4x128xf32>
    %60 = arith.subf %59, %58 : vector<4x128xf32>
    %61 = math.exp %60 : vector<4x128xf32>
    %cst_47 = arith.constant 1.000000e+00 : f32
    %62 = vector.broadcast %cst_47 : f32 to vector<4x128xf32>
    %63 = arith.addf %62, %61 : vector<4x128xf32>
    %64 = tpu.reciprocal %63 {approx = true} : vector<4x128xf32> -> vector<4x128xf32>
    %c3_48 = arith.constant 3 : index
    %c0_49 = arith.constant 0 : index
    %c0_50 = arith.constant 0 : index
    %65 = vector.load %arg4[%c3_48, %c0_49, %c0_50] : memref<4x4x128xf32, #tpu.memory_space<vmem>>, vector<1x4x128xf32>
    %66 = vector.shape_cast %65 : vector<1x4x128xf32> to vector<4x128xf32>
    %67 = vector.shape_cast %64 : vector<4x128xf32> to vector<1x4x128xf32>
    tpu.vector_store %arg4[%c3_48, %c0_49, %c0_50], %67 {strides = array<i32>} : memref<4x4x128xf32, #tpu.memory_space<vmem>>, vector<1x4x128xf32>,
    return
  }
  func.func @transform_0(%arg0: i32) -> (i32, i32, i32) {
    %c0_i32 = arith.constant 0 : i32
    %c0_i32_0 = arith.constant 0 : i32
    %c0_i32_1 = arith.constant 0 : i32
    %c0_i32_2 = arith.constant 0 : i32
    return %c0_i32, %c0_i32_0, %c0_i32_1 : i32, i32, i32
  }
  func.func @transform_1(%arg0: i32) -> (i32, i32, i32) {
    %c0_i32 = arith.constant 0 : i32
    %c0_i32_0 = arith.constant 0 : i32
    %c0_i32_1 = arith.constant 0 : i32
    %c0_i32_2 = arith.constant 0 : i32
    return %c0_i32, %c0_i32_0, %c0_i32_1 : i32, i32, i32
  }
  func.func @transform_2(%arg0: i32) -> (i32, i32) {
    %c0_i32 = arith.constant 0 : i32
    %c0_i32_0 = arith.constant 0 : i32
    %c0_i32_1 = arith.constant 0 : i32
    return %c0_i32, %c0_i32_0 : i32, i32
  }
  func.func @transform_3(%arg0: i32) -> (i32, i32, i32) {
    %c0_i32 = arith.constant 0 : i32
    %c0_i32_0 = arith.constant 0 : i32
    %c0_i32_1 = arith.constant 0 : i32
    %c0_i32_2 = arith.constant 0 : i32
    return %c0_i32, %c0_i32_0, %c0_i32_1 : i32, i32, i32
  }
}

</mosaic_0001>

<bundles_post_ra>
// kernel: eae_forward.5
= control target key start
LH: loop header
LB: loop body
LE: loop exit
PB: predicated region body
PF: predicated region fallthrough
CT: control target
= control target key end

     0   :  { %v100_v1 = vmov 0   ;;  %vm54_vm0 = vcmask 523264   ;;  %s142_s1 = inlined_call_operand.vmem [shape: bf16[64,128], index: 1, kind: input, shape index: {}]   ;;  %s143_s2 = inlined_call_operand.vmem [shape: f32[8,1], index: 2, kind: input, shape index: {}]   ;;  %s144_s0 = inlined_call_operand.vmem [shape: bf16[8,64], index: 0, kind: input, shape index: {}]   ;;  %s145_s3 = inlined_call_operand.vmem [shape: f32[8,128], index: 3, kind: output, shape index: {}]  }
   0x1   :  { %v97_v0 = vld [vmem:[%s142_s1 + $0x18] sm:$0xff]  ;;  %99 = vset.pattern.permute.xlu0 %v100_v1  ;;  %v24_v2 = vld [vmem:[%s143_s2] sm:$0xff]  ;;  %v96_v3 = vld [vmem:[%s142_s1 + $0x10] sm:$0xff] }
   0x2   :  { %62 = vmatpush.bf16.msra.mxu0 %v97_v0  ;;  %27 = vperm.xlu0 %99, %v24_v2   ;;  %v95_v4 = vld [vmem:[%s142_s1 + $0x8] sm:$0xff]  ;;  %v94_v5 = vld [vmem:[%s142_s1] sm:$0xff] }
   0x3   :  { %v15_v6 = vld [vmem:[%s144_s0] sm:$0xf] }
   0x6   :  { %63 = vmatpush.bf16.msra.mxu0 %v96_v3 }
   0xa   :  { %64 = vmatpush.bf16.msra.mxu0 %v95_v4 }
   0xe   :  { %65 = vmatpush.bf16.msra.mxu0 %v94_v5 }
  0x11   :  { %93 = vmatmul.msk.bf16.vlgmr.msra.gmra.mxu0 %vm54_vm0, %v15_v6 }
  0x74   :  { %v28_v7 = vpop.permute.xlu0 %27 }
  0x8e   :  { %v67_v8 = vpop.f32.mrf.mxu0 }
  0x8f   :  { %v68_v9 = vadd.f32 %v67_v8, %v28_v7 }
  0x91   :  { %v71_v10 = vmax.f32 %v68_v9, 0.0 }
  0x93   :  { %72 = vst [vmem:[%s145_s3] sm:$0xff] %v71_v10 }
  0x96   :  { %v69_v11 = vpop.f32.mrf.mxu0 }

// kernel: eae_forward.6
= control target key start
LH: loop header
LB: loop body
LE: loop exit
PB: predicated region body
PF: predicated region fallthrough
CT: control target
= control target key end

     0   :  { %v168_v2 = vmov 0   ;;  %vm114_vm0 = vcmask 261120   ;;  %s228_s1 = inlined_call_operand.vmem [shape: bf16[128,32], index: 1, kind: input, shape index: {}]   ;;  %s229_s2 = inlined_call_operand.vmem [shape: f32[16,1], index: 2, kind: input, shape index: {}]   ;;  %s230_s0 = inlined_call_operand.vmem [shape: bf16[16,128], index: 0, kind: input, shape index: {}]   ;;  %s231_s3 = inlined_call_operand.vmem [shape: f32[16,32], index: 3, kind: output, shape index: {}]  }
   0x1   :  { %v165_v0 = vld [vmem:[%s228_s1 + $0x38] sm:$0xff]  ;;  %v164_v1 = vld [vmem:[%s228_s1 + $0x30] sm:$0xff]  ;;  %167 = vset.pattern.permute.xlu0 %v168_v2  ;;  %v32_v3 = vld [vmem:[%s229_s2] sm:$0xff] }
   0x2   :  { %98 = vmatpush.bf16.msra.mxu0 %v165_v0  ;;  %36 = vperm.xlu0 %167, %v32_v3   ;;  %v163_v4 = vld [vmem:[%s228_s1 + $0x28] sm:$0xff]  ;;  %v162_v6 = vld [vmem:[%s228_s1 + $0x20] sm:$0xff]  ;;  %v161_v7 = vld [vmem:[%s228_s1 + $0x18] sm:$0xff] }
   0x3   :  { %v33_v5 = vld [vmem:[%s229_s2 + $0x8] sm:$0xff]  ;;  %v160_v8 = vld [vmem:[%s228_s1 + $0x10] sm:$0xff]  ;;  %v158_v10 = vld [vmem:[%s228_s1] sm:$0xff] }
   0x4   :  { %v159_v9 = vld [vmem:[%s228_s1 + $0x8] sm:$0xff]  ;;  %v157_v11 = vld [vmem:[%s230_s0] sm:$0xff] }
   0x6   :  { %99 = vmatpush.bf16.msra.mxu0 %v164_v1 }
   0xa   :  { %100 = vmatpush.bf16.msra.mxu0 %v163_v4  ;;  %41 = vperm.xlu0 %167, %v33_v5  }
   0xe   :  { %101 = vmatpush.bf16.msra.mxu0 %v162_v6 }
  0x12   :  { %102 = vmatpush.bf16.msra.mxu0 %v161_v7 }
  0x16   :  { %103 = vmatpush.bf16.msra.mxu0 %v160_v8 }
  0x1a   :  { %104 = vmatpush.bf16.msra.mxu0 %v159_v9 }
  0x1e   :  { %105 = vmatpush.bf16.msra.mxu0 %v158_v10 }
  0x21   :  { %106 = vmatmul.bf16.vlgmr.msra.gmra.mxu0 %v157_v11 }
  0x74   :  { %v37_v12 = vpop.permute.xlu0 %36 }
  0x7c   :  { %v42_v16 = vpop.permute.xlu0 %41 }
  0x9e   :  { %v107_v13 = vpop.f32.mrf.mxu0 }
  0x9f   :  { %v108_v14 = vadd.f32 %v107_v13, %v37_v12 }
  0xa1   :  { %v112_v15 = vmax.f32 %v108_v14, 0.0 }
  0xa3   :  { %115 = vst.msk [vmem:[%s231_s3] sm:$0xff] %vm114_vm0, %v112_v15 }
  0xa6   :  { %v109_v17 = vpop.f32.mrf.mxu0 }
  0xa7   :  { %v110_v18 = vadd.f32 %v109_v17, %v42_v16 }
  0xa9   :  { %v113_v19 = vmax.f32 %v110_v18, 0.0 }
  0xab   :  { %116 = vst.msk [vmem:[%s231_s3 + $0x8] sm:$0xff] %vm114_vm0, %v113_v19 }

// kernel: eae_forward.7
= control target key start
LH: loop header
LB: loop body
LE: loop exit
PB: predicated region body
PF: predicated region fallthrough
CT: control target
= control target key end

     0   :  { %vm222_vm0 = vcmask 261120   ;;  %vm257_vm1 = vcmask 1041408   ;;  %s490_s1 = inlined_call_operand.vmem [shape: bf16[256,32], index: 1, kind: input, shape index: {}]   ;;  %s491_s0 = inlined_call_operand.vmem [shape: bf16[2,256], index: 0, kind: input, shape index: {}]   ;;  %s492_s2 = inlined_call_operand.vmem [shape: f32[1,32], index: 2, kind: input, shape index: {}]   ;;  %s493_s4 = inlined_call_operand.vmem [shape: bf16[32,256], index: 4, kind: input, shape index: {}]   ;;  %s494_s3 = inlined_call_operand.vmem [shape: f32[2,32], index: 3, kind: input, shape index: {}]   ;;  %s495_s5 = inlined_call_operand.vmem [shape: f32[1,256], index: 5, kind: input, shape index: {}]   ;;  %s496_s6 = inlined_call_operand.vmem [shape: f32[2,256], index: 6, kind: output, shape index: {}]  }
   0x1   :  { %v354_v0 = vld [vmem:[%s490_s1 + $0x38] sm:$0xff]  ;;  %v353_v2 = vld [vmem:[%s490_s1 + $0x30] sm:$0xff]  ;;  %v24_v4 = vld [vmem:[%s491_s0] sm:$0x3] }
   0x2   :  { %v362_v1 = vld [vmem:[%s490_s1 + $0x78] sm:$0xff]  ;;  %163 = vmatpush.bf16.msra.mxu0 %v354_v0  ;;  %v361_v3 = vld [vmem:[%s490_s1 + $0x70] sm:$0xff]  ;;  %v352_v5 = vld [vmem:[%s490_s1 + $0x28] sm:$0xff]  ;;  %62 = vst [vmem:[#allocation1] ss:$9 sm:$0xff] %v24_v4 }
   0x3   :  { %176 = vmatpush.bf16.msra.mxu1 %v362_v1  ;;  %v360_v6 = vld [vmem:[%s490_s1 + $0x68] sm:$0xff]  ;;  %v351_v7 = vld [vmem:[%s490_s1 + $0x20] sm:$0xff]  ;;  %v350_v9 = vld [vmem:[%s490_s1 + $0x18] sm:$0xff] }
   0x4   :  { %v359_v8 = vld [vmem:[%s490_s1 + $0x60] sm:$0xff]  ;;  %v358_v10 = vld [vmem:[%s490_s1 + $0x58] sm:$0xff]  ;;  %v349_v11 = vld [vmem:[%s490_s1 + $0x10] sm:$0xff] }
   0x5   :  { %v357_v12 = vld [vmem:[%s490_s1 + $0x50] sm:$0xff]  ;;  %v348_v13 = vld [vmem:[%s490_s1 + $0x8] sm:$0xff]  ;;  %v347_v15 = vld [vmem:[%s490_s1] sm:$0xff] }
   0x6   :  { %164 = vmatpush.bf16.msra.mxu0 %v353_v2  ;;  %v356_v14 = vld [vmem:[%s490_s1 + $0x48] sm:$0xff]  ;;  %v355_v16 = vld [vmem:[%s490_s1 + $0x40] sm:$0xff]  ;;  %v339_v19 = vld [vmem:[%s493_s4 + $0x10] sm:$0xf] }
   0x7   :  { %177 = vmatpush.bf16.msra.mxu1 %v361_v3  ;;  %v366_v20 = vld [vmem:[%s493_s4 + $0x14] sm:$0xf0]  ;;  %v365_v21 = vld [vmem:[%s493_s4 + $0x14] sm:$0xf]  ;;  %v341_v23 = vld [vmem:[%s493_s4 + $0x18] sm:$0xf0] }
   0x8   :  { %v340_v22 = vor.u32 %v366_v20, %v339_v19  ;;  %v344_v24 = vor.u32 %v365_v21, %v341_v23  ;;  %v331_v25 = vld [vmem:[%s493_s4] sm:$0xf]  ;;  %v364_v26 = vld [vmem:[%s493_s4 + $0x4] sm:$0xf0]  ;;  %v363_v28 = vld [vmem:[%s493_s4 + $0x4] sm:$0xf] }
   0x9   :  { %v63_v17 = vld [vmem:[#allocation1] sm:$0xff]  ;;  %v64_v18 = vld [vmem:[#allocation1 + $0x9] sm:$0xff]  ;;  %v332_v27 = vor.u32 %v364_v26, %v331_v25 }
   0xa   :  { %165 = vmatpush.bf16.msra.mxu0 %v352_v5  ;;  %232 = vmatpush.bf16.msra.mxu2 %v340_v22  ;;  %v333_v29 = vld [vmem:[%s493_s4 + $0x8] sm:$0xf0]  ;;  %v367_v31 = vld [vmem:[%s492_s2] ss:$0 sm:$0xff] }
   0xb   :  { %178 = vmatpush.bf16.msra.mxu1 %v360_v6  ;;  %245 = vmatpush.bf16.msra.mxu3 %v344_v24  ;;  %v336_v30 = vor.u32 %v363_v28, %v333_v29  ;;  %v189_v35 = vld [vmem:[%s494_s3] sm:$0x3] }
   0xc   :  { %v196_v41 = vld [vmem:[%s495_s5] sm:$0x3] }
   0xd   :  { %v198_v42 = vperm.slane %v196_v41, 0  ;;  %v199_v43 = vperm.slane %v196_v41, 1 }
   0xe   :  { %166 = vmatpush.bf16.msra.mxu0 %v351_v7  ;;  %233 = vmatpush.bf16.msra.mxu2 %v332_v27 }
   0xf   :  { %179 = vmatpush.bf16.msra.mxu1 %v359_v8  ;;  %246 = vmatpush.bf16.msra.mxu3 %v336_v30 }
  0x12   :  { %167 = vmatpush.bf16.msra.mxu0 %v350_v9 }
  0x13   :  { %180 = vmatpush.bf16.msra.mxu1 %v358_v10 }
  0x16   :  { %168 = vmatpush.bf16.msra.mxu0 %v349_v11 }
  0x17   :  { %181 = vmatpush.bf16.msra.mxu1 %v357_v12 }
  0x1a   :  { %169 = vmatpush.bf16.msra.mxu0 %v348_v13 }
  0x1b   :  { %182 = vmatpush.bf16.msra.mxu1 %v356_v14 }
  0x1e   :  { %170 = vmatpush.bf16.msra.mxu0 %v347_v15 }
  0x1f   :  { %183 = vmatpush.bf16.msra.mxu1 %v355_v16 }
  0x21   :  { %171 = vmatmul.bf16.vlgmr.msra.gmra.mxu0 %v63_v17 }
  0x22   :  { %184 = vmatmul.bf16.vlgmr.msra.gmra.mxu1 %v64_v18 }
  0x9e   :  { %v172_v32 = vpop.f32.mrf.mxu0 }
  0x9f   :  { %v185_v33 = vpop.f32.mrf.mxu1  ;;  %v173_v34 = vadd.f32 %v367_v31, %v172_v32 }
  0xa1   :  { %v186_v36 = vadd.f32 %v185_v33, %v173_v34 }
  0xa3   :  { %v190_v37 = vadd.f32 %v189_v35, %v186_v36 }
  0xa5   :  { %v191_v38 = vpack.c.bf16 %v190_v37, %v190_v37 }
  0xa6   :  { %v174_v39 = vpop.f32.mrf.mxu0 }
  0xa7   :  { %v187_v40 = vpop.f32.mrf.mxu1  ;;  %345 = vmatmul.msk.bf16.vlgmr.msra.gmra.mxu2 %vm222_vm0, %v191_v38  ;;  %346 = vmatmul.msk.bf16.vlgmr.msra.gmra.mxu3 %vm222_vm0, %v191_v38 }
 0x12a   :  { %v235_v44 = vpop.f32.mrf.mxu2  ;;  %v248_v45 = vpop.f32.mrf.mxu3 }
 0x12b   :  { %v236_v46 = vadd.f32 %v235_v44, %v198_v42  ;;  %v249_v47 = vadd.f32 %v248_v45, %v199_v43 }
 0x12d   :  { %v253_v48 = vmax.f32 %v249_v47, 0.0  ;;  %v252_v49 = vmax.f32 %v236_v46, 0.0 }
 0x12f   :  { %v256_v50 = vrot.slane %v253_v48, 6 }
 0x131   :  { %v258_v51 = vsel %vm257_vm1, %v252_v49, %v256_v50 }
 0x132   :  { %260 = vst [vmem:[%s496_s6] sm:$0xf] %v258_v51  ;;  %v237_v52 = vpop.f32.mrf.mxu2  ;;  %v250_v53 = vpop.f32.mrf.mxu3 }

// kernel: eae_forward.8
= control target key start
LH: loop header
LB: loop body
LE: loop exit
PB: predicated region body
PF: predicated region fallthrough
CT: control target
= control target key end

     0   :  { %v375_v3 = vmov 0   ;;  %vm54_vm0 = vcmask 523264   ;;  %vm72_vm1 = vcmask 261120   ;;  %s471_s1 = inlined_call_operand.vmem [shape: bf16[4,64,32], index: 1, kind: input, shape index: {}]   ;;  %s472_s2 = inlined_call_operand.vmem [shape: f32[8,1], index: 2, kind: input, shape index: {}]   ;;  %s473_s0 = inlined_call_operand.vmem [shape: bf16[4,8,64], index: 0, kind: input, shape index: {}]   ;;  %s474_s3 = inlined_call_operand.vmem [shape: f32[4,8,32], index: 3, kind: output, shape index: {}]  }
   0x1   :  { %v359_v0 = vld [vmem:[%s471_s1 + $0x18] sm:$0xff]  ;;  %374 = vset.pattern.permute.xlu1 %v375_v3  ;;  %373 = vset.pattern.permute.xlu0 %v375_v3  ;;  %v358_v5 = vld [vmem:[%s471_s1 + $0x10] sm:$0xff]  ;;  %v357_v9 = vld [vmem:[%s471_s1 + $0x8] sm:$0xff] }
   0x2   :  { %v363_v1 = vld [vmem:[%s471_s1 + $0x38] sm:$0xff]  ;;  %62 = vmatpush.bf16.msra.mxu0 %v359_v0  ;;  %v362_v6 = vld [vmem:[%s471_s1 + $0x30] sm:$0xff]  ;;  %v361_v10 = vld [vmem:[%s471_s1 + $0x28] sm:$0xff] }
   0x3   :  { %v367_v2 = vld [vmem:[%s471_s1 + $0x58] sm:$0xff]  ;;  %122 = vmatpush.bf16.msra.mxu1 %v363_v1  ;;  %v366_v7 = vld [vmem:[%s471_s1 + $0x50] sm:$0xff]  ;;  %v145_v11 = vld [vmem:[%s472_s2] sm:$0xff] }
   0x4   :  { %v371_v4 = vld [vmem:[%s471_s1 + $0x78] sm:$0xff]  ;;  %182 = vmatpush.bf16.msra.mxu2 %v367_v2  ;;  %v370_v8 = vld [vmem:[%s471_s1 + $0x70] sm:$0xff]  ;;  %v365_v12 = vld [vmem:[%s471_s1 + $0x48] sm:$0xff]  ;;  %148 = vperm.xlu1 %374, %v145_v11  }
   0x5   :  { %242 = vmatpush.bf16.msra.mxu3 %v371_v4  ;;  %v369_v13 = vld [vmem:[%s471_s1 + $0x68] sm:$0xff]  ;;  %27 = vperm.xlu0 %373, %v145_v11   ;;  %v356_v14 = vld [vmem:[%s471_s1] sm:$0xff] }
   0x6   :  { %63 = vmatpush.bf16.msra.mxu0 %v358_v5  ;;  %v360_v15 = vld [vmem:[%s471_s1 + $0x20] sm:$0xff]  ;;  %v302_v20 = vld [vmem:[%s473_s0 + $0x8] sm:$0xf]  ;;  %v329_v21 = vld [vmem:[%s473_s0 + $0xc] sm:$0xf] }
   0x7   :  { %123 = vmatpush.bf16.msra.mxu1 %v362_v6  ;;  %v364_v16 = vld [vmem:[%s471_s1 + $0x40] sm:$0xff] }
   0x8   :  { %183 = vmatpush.bf16.msra.mxu2 %v366_v7  ;;  %v368_v17 = vld [vmem:[%s471_s1 + $0x60] sm:$0xff] }
   0x9   :  { %243 = vmatpush.bf16.msra.mxu3 %v370_v8  ;;  %v15_v18 = vld [vmem:[%s473_s0] sm:$0xf]  ;;  %v275_v19 = vld [vmem:[%s473_s0 + $0x4] sm:$0xf] }
   0xa   :  { %64 = vmatpush.bf16.msra.mxu0 %v357_v9 }
   0xb   :  { %124 = vmatpush.bf16.msra.mxu1 %v361_v10 }
   0xc   :  { %184 = vmatpush.bf16.msra.mxu2 %v365_v12  ;;  %208 = vperm.xlu1 %374, %v145_v11  }
   0xd   :  { %244 = vmatpush.bf16.msra.mxu3 %v369_v13  ;;  %88 = vperm.xlu0 %373, %v145_v11  }
   0xe   :  { %65 = vmatpush.bf16.msra.mxu0 %v356_v14 }
   0xf   :  { %125 = vmatpush.bf16.msra.mxu1 %v360_v15 }
  0x10   :  { %185 = vmatpush.bf16.msra.mxu2 %v364_v16 }
  0x11   :  { %245 = vmatpush.bf16.msra.mxu3 %v368_v17  ;;  %274 = vmatmul.msk.bf16.vlgmr.msra.gmra.mxu0 %vm54_vm0, %v15_v18 }
  0x12   :  { %300 = vmatmul.msk.bf16.vlgmr.msra.gmra.mxu1 %vm54_vm0, %v275_v19 }
  0x13   :  { %327 = vmatmul.msk.bf16.vlgmr.msra.gmra.mxu2 %vm54_vm0, %v302_v20 }
  0x14   :  { %354 = vmatmul.msk.bf16.vlgmr.msra.gmra.mxu3 %vm54_vm0, %v329_v21 }
  0x76   :  { %v149_v23 = vpop.permute.xlu1 %148 }
  0x77   :  { %v28_v22 = vpop.permute.xlu0 %27 }
  0x7e   :  { %v209_v31 = vpop.permute.xlu1 %208 }
  0x7f   :  { %v89_v24 = vpop.permute.xlu0 %88 }
  0x8e   :  { %v67_v25 = vpop.f32.mrf.mxu0 }
  0x8f   :  { %v127_v26 = vpop.f32.mrf.mxu1  ;;  %v68_v27 = vadd.f32 %v67_v25, %v28_v22 }
  0x90   :  { %v128_v28 = vadd.f32 %v127_v26, %v89_v24 }
  0x91   :  { %v71_v29 = vmax.f32 %v68_v27, 0.0 }
  0x92   :  { %v131_v30 = vmax.f32 %v128_v28, 0.0 }
  0x93   :  { %73 = vst.msk [vmem:[%s474_s3] sm:$0xff] %vm72_vm1, %v71_v29 }
  0x94   :  { %301 = vst.msk [vmem:[%s474_s3 + $0x8] sm:$0xff] %vm72_vm1, %v131_v30 }
  0x96   :  { %v187_v32 = vpop.f32.mrf.mxu2  ;;  %v69_v36 = vpop.f32.mrf.mxu0 }
  0x97   :  { %v247_v33 = vpop.f32.mrf.mxu3  ;;  %v188_v34 = vadd.f32 %v187_v32, %v149_v23  ;;  %v129_v37 = vpop.f32.mrf.mxu1 }
  0x98   :  { %v248_v35 = vadd.f32 %v247_v33, %v209_v31 }
  0x99   :  { %v191_v38 = vmax.f32 %v188_v34, 0.0 }
  0x9a   :  { %v251_v39 = vmax.f32 %v248_v35, 0.0 }
  0x9b   :  { %328 = vst.msk [vmem:[%s474_s3 + $0x10] sm:$0xff] %vm72_vm1, %v191_v38 }
  0x9c   :  { %355 = vst.msk [vmem:[%s474_s3 + $0x18] sm:$0xff] %vm72_vm1, %v251_v39 }
  0x9e   :  { %v189_v40 = vpop.f32.mrf.mxu2 }
  0x9f   :  { %v249_v41 = vpop.f32.mrf.mxu3 }

// kernel: eae_forward.9
= control target key start
LH: loop header
LB: loop body
LE: loop exit
PB: predicated region body
PF: predicated region fallthrough
CT: control target
= control target key end

     0   :  { %v290_v3 = vmov 0   ;;  %vm38_vm0 = vcmask 261120   ;;  %s371_s1 = inlined_call_operand.vmem [shape: bf16[4,32,128], index: 1, kind: input, shape index: {}]   ;;  %s372_s2 = inlined_call_operand.vmem [shape: f32[4,1], index: 2, kind: input, shape index: {}]   ;;  %s373_s0 = inlined_call_operand.vmem [shape: bf16[4,4,32], index: 0, kind: input, shape index: {}]   ;;  %s374_s3 = inlined_call_operand.vmem [shape: f32[4,4,128], index: 3, kind: output, shape index: {}]  }
   0x1   :  { %v264_v0 = vld [vmem:[%s371_s1 + $0x8] sm:$0xff]  ;;  %v266_v1 = vld [vmem:[%s371_s1 + $0x18] sm:$0xff]  ;;  %273 = vset.pattern.permute.xlu1 %v290_v3  ;;  %272 = vset.pattern.permute.xlu0 %v290_v3  ;;  %v263_v5 = vld [vmem:[%s371_s1] sm:$0xff] }
   0x2   :  { %v268_v2 = vld [vmem:[%s371_s1 + $0x28] sm:$0xff]  ;;  %v270_v4 = vld [vmem:[%s371_s1 + $0x38] sm:$0xff]  ;;  %48 = vmatpush.bf16.msra.mxu0 %v264_v0  ;;  %95 = vmatpush.bf16.msra.mxu1 %v266_v1  ;;  %v265_v6 = vld [vmem:[%s371_s1 + $0x10] sm:$0xff] }
   0x3   :  { %143 = vmatpush.bf16.msra.mxu2 %v268_v2  ;;  %191 = vmatpush.bf16.msra.mxu3 %v270_v4  ;;  %v267_v7 = vld [vmem:[%s371_s1 + $0x20] sm:$0xff]  ;;  %v269_v8 = vld [vmem:[%s371_s1 + $0x30] sm:$0xff] }
   0x4   :  { %v116_v9 = vld [vmem:[%s372_s2] sm:$0xf]  ;;  %v233_v13 = vld [vmem:[%s373_s0 + $0x4] sm:$0x3]  ;;  %v248_v14 = vld [vmem:[%s373_s0 + $0x6] sm:$0x3] }
   0x5   :  { %v20_v10 = vld [vmem:[%s372_s2] sm:$0xf]  ;;  %119 = vperm.xlu1 %273, %v116_v9  }
   0x6   :  { %23 = vperm.xlu0 %272, %v20_v10   ;;  %49 = vmatpush.bf16.msra.mxu0 %v263_v5  ;;  %v15_v11 = vld [vmem:[%s373_s0] sm:$0x3]  ;;  %v218_v12 = vld [vmem:[%s373_s0 + $0x2] sm:$0x3] }
   0x7   :  { %96 = vmatpush.bf16.msra.mxu1 %v265_v6  ;;  %144 = vmatpush.bf16.msra.mxu2 %v267_v7  ;;  %v164_v15 = vld [vmem:[%s372_s2] sm:$0xf] }
   0x8   :  { %192 = vmatpush.bf16.msra.mxu3 %v269_v8  ;;  %v68_v16 = vld [vmem:[%s372_s2] sm:$0xf] }
   0x9   :  { %217 = vmatmul.msk.bf16.vlgmr.msra.gmra.mxu0 %vm38_vm0, %v15_v11 }
   0xa   :  { %231 = vmatmul.msk.bf16.vlgmr.msra.gmra.mxu1 %vm38_vm0, %v218_v12  ;;  %246 = vmatmul.msk.bf16.vlgmr.msra.gmra.mxu2 %vm38_vm0, %v233_v13 }
   0xb   :  { %261 = vmatmul.msk.bf16.vlgmr.msra.gmra.mxu3 %vm38_vm0, %v248_v14 }
   0xd   :  { %167 = vperm.xlu1 %273, %v164_v15  }
   0xe   :  { %71 = vperm.xlu0 %272, %v68_v16  }
  0x77   :  { %v120_v18 = vpop.permute.xlu1 %119 }
  0x78   :  { %v24_v17 = vpop.permute.xlu0 %23 }
  0x7f   :  { %v168_v28 = vpop.permute.xlu1 %167 }
  0x80   :  { %v72_v19 = vpop.permute.xlu0 %71 }
  0x86   :  { %v51_v20 = vpop.f32.mrf.mxu0 }
  0x87   :  { %v98_v21 = vpop.f32.mrf.mxu1  ;;  %v52_v22 = vadd.f32 %v51_v20, %v24_v17 }
  0x88   :  { %v99_v23 = vadd.f32 %v98_v21, %v72_v19 }
  0x89   :  { %v55_v24 = vsub.f32 0.0, %v52_v22 }
  0x8a   :  { %v102_v25 = vsub.f32 0.0, %v99_v23 }
  0x8b   :  { %v56_v26 = vmul.f32 1.442695, %v55_v24 }
  0x8c   :  { %v103_v27 = vmul.f32 1.442695, %v102_v25 }
  0x8d   :  { %274 = vpow2.f32 %v56_v26  ;;  %v146_v29 = vpop.f32.mrf.mxu2 }
  0x8e   :  { %v194_v30 = vpop.f32.mrf.mxu3  ;;  %276 = vpow2.f32 %v103_v27  ;;  %v147_v31 = vadd.f32 %v146_v29, %v120_v18  ;;  %v53_v33 = vpop.f32.mrf.mxu0 }
  0x8f   :  { %v195_v32 = vadd.f32 %v194_v30, %v168_v28  ;;  %v100_v34 = vpop.f32.mrf.mxu1 }
  0x90   :  { %v150_v35 = vsub.f32 0.0, %v147_v31 }
  0x91   :  { %v198_v36 = vsub.f32 0.0, %v195_v32 }
  0x92   :  { %v151_v37 = vmul.f32 1.442695, %v150_v35 }
  0x93   :  { %v199_v38 = vmul.f32 1.442695, %v198_v36  ;;  %v275_v39 = vpop.eup %274 }
  0x94   :  { %v277_v40 = vpop.eup %276  ;;  %v58_v41 = vadd.f32 1.0, %v275_v39  ;;  %278 = vpow2.f32 %v151_v37 }
  0x95   :  { %v105_v42 = vadd.f32 1.0, %v277_v40  ;;  %280 = vpow2.f32 %v199_v38  ;;  %v148_v43 = vpop.f32.mrf.mxu2 }
  0x96   :  { %v196_v44 = vpop.f32.mrf.mxu3  ;;  %282 = vrcp.f32 %v58_v41 }
  0x97   :  { %284 = vrcp.f32 %v105_v42 }
  0x9a   :  { %v279_v45 = vpop.eup %278 }
  0x9b   :  { %v281_v46 = vpop.eup %280  ;;  %v153_v47 = vadd.f32 1.0, %v279_v45 }
  0x9c   :  { %v283_v48 = vpop.eup %282  ;;  %v201_v49 = vadd.f32 1.0, %v281_v46 }
  0x9d   :  { %v285_v50 = vpop.eup %284  ;;  %60 = vst [vmem:[%s374_s3] sm:$0xf] %v283_v48  ;;  %286 = vrcp.f32 %v153_v47 }
  0x9e   :  { %232 = vst [vmem:[%s374_s3 + $0x4] sm:$0xf] %v285_v50  ;;  %288 = vrcp.f32 %v201_v49 }
  0xa3   :  { %v287_v51 = vpop.eup %286 }
  0xa4   :  { %v289_v52 = vpop.eup %288  ;;  %247 = vst [vmem:[%s374_s3 + $0x8] sm:$0xf] %v287_v51 }
  0xa5   :  { %262 = vst [vmem:[%s374_s3 + $0xc] sm:$0xf] %v289_v52 }

</bundles_post_ra>
